<compile_context>
chip_gen: v7x
topology: tpu7x:2x2x1
jax: 0.10.0
libtpu: 0.0.40
codegen_flags: <defaults>
</compile_context>

<pallas_src>
import functools

import jax
import jax.numpy as jnp
from jax.experimental import pallas as pl
from jax.experimental.pallas import tpu as pltpu


def _round_up(n, m):
    return ((n + m - 1) // m) * m


def _tensorcores_per_chip():
    """Best-effort detection of TensorCores per chip (2 on v7x, else 1)."""
    try:
        kind = jax.devices()[0].device_kind.lower()
    except Exception:
        return 1
    return 2 if "v7" in kind else 1


def decoder_mlp_kernel(hT_ref, gT_ref, w_ref, b_ref, outT_ref, *,
                       dz, dx, h1, h2, x2, h1_8, h2_8, act):
    """Transposed-layout MLP: every activation is (features, batch_tile).

    Packed weight rows (all offsets are static multiples of 8, so every pl.ds
    below is sublane-aligned and needs no relayout):
        [0            : h1)   W1_h^T (h1, dz)
        [h1_8         : h1)   W1_g^T (h1, dx)
        [2*h1_8       : h2)   W2^T   (h2, h1)
        [2*h1_8+h2_8  : x2)   W3^T   (x2, h2)
    Packed bias rows:
        [0            : h1)   b1 (h1, 1)
        [h1_8         : h2)   b2 (h2, 1)
        [h1_8+h2_8    : x2)   b3 (x2, 1)
    """
    r_w1g = h1_8
    r_w2 = 2 * h1_8
    r_w3 = 2 * h1_8 + h2_8
    r_b2 = h1_8
    r_b3 = h1_8 + h2_8

    w1hT = w_ref[pl.ds(0, h1), pl.ds(0, dz)]        # (h1, dz)
    w1gT = w_ref[pl.ds(r_w1g, h1), pl.ds(0, dx)]    # (h1, dx)
    w2T = w_ref[pl.ds(r_w2, h2), pl.ds(0, h1)]      # (h2, h1)
    w3T = w_ref[pl.ds(r_w3, x2), pl.ds(0, h2)]      # (x2, h2)

    b1 = b_ref[pl.ds(0, h1), :]                     # (h1, 1), f32
    b2 = b_ref[pl.ds(r_b2, h2), :]                  # (h2, 1), f32
    b3 = b_ref[pl.ds(r_b3, x2), :]                  # (x2, 1), f32

    hT = hT_ref[...]                                # (dz, tile_b)
    gT = gT_ref[...]                                # (dx, tile_b)

    # Layer 1: W1^T @ cat(h, g)^T == W1h^T @ h^T + W1g^T @ g^T   (no concat).
    pre1 = (jnp.dot(w1hT, hT, preferred_element_type=jnp.float32)
            + jnp.dot(w1gT, gT, preferred_element_type=jnp.float32)
            + b1)
    a1 = act(pre1)                                  # f32

    # Layer 2: activation stays f32; matmul operands use the weights' dtype.
    pre2 = jnp.dot(w2T, a1.astype(w2T.dtype),
                   preferred_element_type=jnp.float32) + b2
    a2 = act(pre2)                                  # f32

    # Output layer: single lane-dense (2*x_dim, tile_b) store.
    outT_ref[...] = (jnp.dot(w3T, a2.astype(w3T.dtype),
                             preferred_element_type=jnp.float32)
                     + b3).astype(outT_ref.dtype)


def _xla_forward(h, g_fwd, params, x_dim, act):
    """Plain XLA path for tiny batches (lets XLA fuse the 3 small matmuls)."""
    w1, b1, w2, b2, w3, b3 = params
    x = jnp.concatenate([h, g_fwd], axis=1)
    a1 = act(x @ w1 + b1)
    a2 = act(a1 @ w2 + b2)
    out = a2 @ w3 + b3
    return out[:, :x_dim], out[:, x_dim:]


def decoder_mlp_forward(h, g_fwd, params, x_dim, *, activation="tanh",
                        max_tile_b=1024, compute_dtype=jnp.float32,
                        min_pallas_batch=512):
    """Pallas DecoderMLP forward. h: (B, Dz), g_fwd: (B, Dx) -> (mu, logvar)."""
    w1, b1, w2, b2, w3, b3 = params
    batch, dz = h.shape
    dx = g_fwd.shape[1]
    h1 = w1.shape[1]
    h2 = w2.shape[1]
    x2 = 2 * x_dim
    # TODO(synk): packing assumes exactly two hidden layers (the module
    # default); arbitrary layers_dim lists would need a generalized pack and an
    # in-kernel layer loop.
    assert w1.shape[0] == dz + dx
    assert w2.shape[0] == h1 and w3.shape[0] == h2 and w3.shape[1] == x2

    if activation == "tanh":
        act = jnp.tanh
    elif activation == "relu":
        act = lambda v: jnp.maximum(v, 0.0)
    else:
        raise ValueError(f"Activation {activation!r} not supported.")

    # Dispatch threshold: below this, pallas_call launch + DMA setup dominates.
    if batch < min_pallas_batch:
        return _xla_forward(h, g_fwd, params, x_dim, act)

    h1_8 = _round_up(h1, 8)
    h2_8 = _round_up(h2, 8)
    x2_8 = _round_up(x2, 8)
    kmax = max(dz, dx, h1, h2)

    def pad_to(a, rows, cols):
        return jnp.pad(a, ((0, rows - a.shape[0]), (0, cols - a.shape[1])))

    # Packed, pre-transposed ((out, in)) weights; sublane-aligned row segments.
    # Pure layout work, outside the kernel.
    w1T = w1.T
    wpack = jnp.concatenate([
        pad_to(w1T[:, :dz], h1_8, kmax),   # W1_h^T
        pad_to(w1T[:, dz:], h1_8, kmax),   # W1_g^T
        pad_to(w2.T, h2_8, kmax),          # W2^T
        pad_to(w3.T, x2_8, kmax),          # W3^T
    ], axis=0).astype(compute_dtype)       # (2*h1_8 + h2_8 + x2_8, kmax)
    bpack = jnp.concatenate([
        pad_to(b1.T, h1_8, 1),
        pad_to(b2.T, h2_8, 1),
        pad_to(b3.T, x2_8, 1),
    ], axis=0).astype(jnp.float32)         # bias add / activation stay f32

    # Transposed activations: batch on the 128-lane axis (lane-dense output).
    hT = h.T.astype(compute_dtype)
    gT = g_fwd.T.astype(compute_dtype)

    # Batch tiling (lane axis => tiles are multiples of 128).
    max_tile_b = max(128, _round_up(max_tile_b, 128))
    b_lane = _round_up(batch, 128)
    tile_b = min(max_tile_b, b_lane)
    n_tc = _tensorcores_per_chip()
    if n_tc > 1 and b_lane >= n_tc * 128:
        # v7x: keep >= n_tc parallel grid steps so both TensorCores get work.
        tile_b = min(tile_b, _round_up(-(-b_lane // n_tc), 128))
    b_pad = _round_up(b_lane, tile_b)
    if b_pad != batch:
        hT = jnp.pad(hT, ((0, 0), (0, b_pad - batch)))
        gT = jnp.pad(gT, ((0, 0), (0, b_pad - batch)))

    kernel = functools.partial(decoder_mlp_kernel, dz=dz, dx=dx, h1=h1, h2=h2,
                               x2=x2, h1_8=h1_8, h2_8=h2_8, act=act)

    itemsize = jnp.dtype(compute_dtype).itemsize
    cost = pl.CostEstimate(
        flops=int(2 * b_pad * ((dz + dx) * h1 + h1 * h2 + h2 * x2)),
        transcendentals=int(b_pad * (h1 + h2)) if activation == "tanh" else 0,
        bytes_accessed=int((hT.size + gT.size + wpack.size) * itemsize
                           + bpack.size * 4 + x2 * b_pad * 4),
    )

    def call_pallas(param_pipeline_mode):
        extra = ({} if param_pipeline_mode is None
                 else dict(pipeline_mode=param_pipeline_mode))
        return pl.pallas_call(
            kernel,
            out_shape=jax.ShapeDtypeStruct((x2, b_pad), jnp.float32),
            grid=(b_pad // tile_b,),
            in_specs=[
                pl.BlockSpec((dz, tile_b), lambda i: (0, i)),
                pl.BlockSpec((dx, tile_b), lambda i: (0, i)),
                # Resident parameter blocks (constant index_map).
                pl.BlockSpec(wpack.shape, lambda i: (0, 0), **extra),
                pl.BlockSpec(bpack.shape, lambda i: (0, 0), **extra),
            ],
            out_specs=pl.BlockSpec((x2, tile_b), lambda i: (0, i)),
            compiler_params=pltpu.CompilerParams(
                dimension_semantics=("parallel",)),
            cost_estimate=cost,
        )(hT, gT, wpack, bpack)

    try:
        # Single-buffer the resident weight/bias packs (halves weight VMEM at
        # large hdim; matters most on v7x's 64 MiB VMEM).
        outT = call_pallas(pl.Buffered(1))
    except Exception:
        # Fallback for jax builds where pipeline_mode isn't supported by the
        # TPU pallas_call pipeline; default double-buffering is still correct.
        outT = call_pallas(None)

    out = outT[:, :batch].T                # (batch, 2*x_dim), lane-dense store
    return out[:, :x_dim], out[:, x_dim:]


def init_params(key, rnn_z_hidden_dim, rnn_x_hidden_dim, layers_dim, x_dim):
    """Deterministic init mirroring the nn.Linear shapes.

    Weights are (in, out); biases are (1, out).
    """
    in_dim = rnn_z_hidden_dim + rnn_x_hidden_dim
    dims = [in_dim] + list(layers_dim) + [2 * x_dim]
    params = []
    for i in range(len(dims) - 1):
        key, kw, kb = jax.random.split(key, 3)
        fan_in = dims[i]
        bound = 1.0 / jnp.sqrt(fan_in)
        w = jax.random.uniform(kw, (dims[i], dims[i + 1]),
                               minval=-bound, maxval=bound, dtype=jnp.float32)
        b = jax.random.uniform(kb, (1, dims[i + 1]),
                               minval=-bound, maxval=bound, dtype=jnp.float32)
        params.extend([w, b])
    return tuple(params)


def reference_forward(h, g_fwd, params, x_dim):
    """Plain-JAX reference for correctness checking."""
    w1, b1, w2, b2, w3, b3 = params
    x = jnp.concatenate([h, g_fwd], axis=1)
    h1 = jnp.tanh(x @ w1 + b1)
    h2 = jnp.tanh(h1 @ w2 + b2)
    out = h2 @ w3 + b3
    return out[:, :x_dim], out[:, x_dim:]


if __name__ == "__main__":
    # Small shapes consistent with the module defaults.
    batch = 2
    x_dim = 4
    rnn_z_hidden_dim = 32
    rnn_x_hidden_dim = 32
    layers_dim = [16, 16]  # DecoderMLP.default_num_units x default_num_layers

    key = jax.random.PRNGKey(0)
    key, kh, kg, kp = jax.random.split(key, 4)
    h = jax.random.normal(kh, (batch, rnn_z_hidden_dim), dtype=jnp.float32)
    g_fwd = jax.random.normal(kg, (batch, rnn_x_hidden_dim), dtype=jnp.float32)
    params = init_params(kp, rnn_z_hidden_dim, rnn_x_hidden_dim, layers_dim,
                         x_dim)

    # 1) Small-batch check through the Pallas path (dispatch threshold forced
    #    off so the kernel itself is exercised at module-default shapes).
    mu, logvar = decoder_mlp_forward(h, g_fwd, params, x_dim,
                                     min_pallas_batch=0)
    mu = jax.block_until_ready(mu)
    logvar = jax.block_until_ready(logvar)
    mu_ref, logvar_ref = reference_forward(h, g_fwd, params, x_dim)
    assert mu.shape == (batch, x_dim) and logvar.shape == (batch, x_dim)
    assert jnp.allclose(mu, mu_ref, atol=1e-5, rtol=1e-5)
    assert jnp.allclose(logvar, logvar_ref, atol=1e-5, rtol=1e-5)

    # 2) Larger batch: exercises the multi-tile "parallel" grid in f32.
    big = 1024
    key, kh2, kg2 = jax.random.split(key, 3)
    h2 = jax.random.normal(kh2, (big, rnn_z_hidden_dim), dtype=jnp.float32)
    g2 = jax.random.normal(kg2, (big, rnn_x_hidden_dim), dtype=jnp.float32)
    mu2, lv2 = decoder_mlp_forward(h2, g2, params, x_dim, max_tile_b=512)
    mu2 = jax.block_until_ready(mu2)
    mu2_ref, lv2_ref = reference_forward(h2, g2, params, x_dim)
    assert jnp.allclose(mu2, mu2_ref, atol=1e-5, rtol=1e-5)
    assert jnp.allclose(lv2, lv2_ref, atol=1e-5, rtol=1e-5)

    # 3) bf16 matmul-operand path (v6e/v7x recommendation), relaxed tolerance.
    mu3, lv3 = decoder_mlp_forward(h2, g2, params, x_dim,
                                   compute_dtype=jnp.bfloat16)
    mu3 = jax.block_until_ready(mu3)
    assert jnp.allclose(mu3, mu2_ref, atol=1e-1, rtol=1e-1)
    assert jnp.allclose(lv3, lv2_ref, atol=1e-1, rtol=1e-1)

    print("KERNEL_OK")
</pallas_src>

<mosaic_0001>
module attributes {stable_mosaic.version = 11 : i64} {
  func.func @decoder_mlp_kernel(%arg0: i32, %arg1: memref<32x128xf32, #tpu.memory_space<vmem>>, %arg2: memref<32x128xf32, #tpu.memory_space<vmem>>, %arg3: memref<56x32xf32, #tpu.memory_space<vmem>>, %arg4: memref<40x1xf32, #tpu.memory_space<vmem>>, %arg5: memref<8x128xf32, #tpu.memory_space<vmem>>) attributes {dimension_semantics = [#tpu.dimension_semantics<parallel>], iteration_bounds = array<i64: 1>, scalar_prefetch = 0 : i64, scratch_operands = 0 : i64, tpu.core_type = #tpu.core_type<tc>, window_params = [{transform_indices = @transform_0, window_bounds = array<i64: 32, 128>}, {transform_indices = @transform_1, window_bounds = array<i64: 32, 128>}, {pipeline_mode = #tpu.pipeline_mode<synchronous>, transform_indices = @transform_2, window_bounds = array<i64: 56, 32>}, {pipeline_mode = #tpu.pipeline_mode<synchronous>, transform_indices = @transform_3, window_bounds = array<i64: 40, 1>}, {transform_indices = @transform_4, window_bounds = array<i64: 8, 128>}]} {
    %c0 = arith.constant 0 : index
    %c0_0 = arith.constant 0 : index
    %0 = vector.load %arg3[%c0, %c0_0] : memref<56x32xf32, #tpu.memory_space<vmem>>, vector<16x32xf32>
    %c16 = arith.constant 16 : index
    %c0_1 = arith.constant 0 : index
    %1 = vector.load %arg3[%c16, %c0_1] : memref<56x32xf32, #tpu.memory_space<vmem>>, vector<16x32xf32>
    %c32 = arith.constant 32 : index
    %c0_2 = arith.constant 0 : index
    %2 = vector.load %arg3[%c32, %c0_2] : memref<56x32xf32, #tpu.memory_space<vmem>>, vector<16x16xf32>
    %c48 = arith.constant 48 : index
    %c0_3 = arith.constant 0 : index
    %3 = vector.load %arg3[%c48, %c0_3] : memref<56x32xf32, #tpu.memory_space<vmem>>, vector<8x16xf32>
    %c0_4 = arith.constant 0 : index
    %c0_5 = arith.constant 0 : index
    %4 = vector.load %arg4[%c0_4, %c0_5] : memref<40x1xf32, #tpu.memory_space<vmem>>, vector<16x1xf32>
    %c16_6 = arith.constant 16 : index
    %c0_7 = arith.constant 0 : index
    %5 = vector.load %arg4[%c16_6, %c0_7] : memref<40x1xf32, #tpu.memory_space<vmem>>, vector<16x1xf32>
    %c32_8 = arith.constant 32 : index
    %c0_9 = arith.constant 0 : index
    %6 = vector.load %arg4[%c32_8, %c0_9] : memref<40x1xf32, #tpu.memory_space<vmem>>, vector<8x1xf32>
    %c0_10 = arith.constant 0 : index
    %c0_11 = arith.constant 0 : index
    %7 = vector.load %arg1[%c0_10, %c0_11] : memref<32x128xf32, #tpu.memory_space<vmem>>, vector<32x128xf32>
    %c0_12 = arith.constant 0 : index
    %c0_13 = arith.constant 0 : index
    %8 = vector.load %arg2[%c0_12, %c0_13] : memref<32x128xf32, #tpu.memory_space<vmem>>, vector<32x128xf32>
    %cst = arith.constant dense<0.000000e+00> : vector<16x128xf32>
    %9 = tpu.matmul %0, %7, %cst {dimension_numbers = #tpu.dot_dimension_numbers<[1], [0], [0], [1], [0, 0, 1, 1], [], []>} : vector<16x32xf32>, vector<32x128xf32>, vector<16x128xf32> -> vector<16x128xf32>
    %cst_14 = arith.constant dense<0.000000e+00> : vector<16x128xf32>
    %10 = tpu.matmul %1, %8, %cst_14 {dimension_numbers = #tpu.dot_dimension_numbers<[1], [0], [0], [1], [0, 0, 1, 1], [], []>} : vector<16x32xf32>, vector<32x128xf32>, vector<16x128xf32> -> vector<16x128xf32>
    %11 = arith.addf %9, %10 : vector<16x128xf32>
    %12 = vector.broadcast %4 : vector<16x1xf32> to vector<16x128xf32>
    %13 = arith.addf %11, %12 : vector<16x128xf32>
    %14 = math.tanh %13 : vector<16x128xf32>
    %cst_15 = arith.constant dense<0.000000e+00> : vector<16x128xf32>
    %15 = tpu.matmul %2, %14, %cst_15 {dimension_numbers = #tpu.dot_dimension_numbers<[1], [0], [0], [1], [0, 0, 1, 1], [], []>} : vector<16x16xf32>, vector<16x128xf32>, vector<16x128xf32> -> vector<16x128xf32>
    %16 = vector.broadcast %5 : vector<16x1xf32> to vector<16x128xf32>
    %17 = arith.addf %15, %16 : vector<16x128xf32>
    %18 = math.tanh %17 : vector<16x128xf32>
    %cst_16 = arith.constant dense<0.000000e+00> : vector<8x128xf32>
    %19 = tpu.matmul %3, %18, %cst_16 {dimension_numbers = #tpu.dot_dimension_numbers<[1], [0], [0], [1], [0, 0, 1, 1], [], []>} : vector<8x16xf32>, vector<16x128xf32>, vector<8x128xf32> -> vector<8x128xf32>
    %20 = vector.broadcast %6 : vector<8x1xf32> to vector<8x128xf32>
    %21 = arith.addf %19, %20 : vector<8x128xf32>
    %c0_17 = arith.constant 0 : index
    %c0_18 = arith.constant 0 : index
    %22 = vector.load %arg5[%c0_17, %c0_18] : memref<8x128xf32, #tpu.memory_space<vmem>>, vector<8x128xf32>
    tpu.vector_store %arg5[%c0_17, %c0_18], %21 {strides = array<i32>} : memref<8x128xf32, #tpu.memory_space<vmem>>, vector<8x128xf32>,
    return
  }
  func.func @transform_0(%arg0: i32) -> (i32, i32) {
    %c0_i32 = arith.constant 0 : i32
    %c0_i32_0 = arith.constant 0 : i32
    return %c0_i32, %arg0 : i32, i32
  }
  func.func @transform_1(%arg0: i32) -> (i32, i32) {
    %c0_i32 = arith.constant 0 : i32
    %c0_i32_0 = arith.constant 0 : i32
    return %c0_i32, %arg0 : i32, i32
  }
  func.func @transform_2(%arg0: i32) -> (i32, i32) {
    %c0_i32 = arith.constant 0 : i32
    %c0_i32_0 = arith.constant 0 : i32
    %c0_i32_1 = arith.constant 0 : i32
    return %c0_i32, %c0_i32_0 : i32, i32
  }
  func.func @transform_3(%arg0: i32) -> (i32, i32) {
    %c0_i32 = arith.constant 0 : i32
    %c0_i32_0 = arith.constant 0 : i32
    %c0_i32_1 = arith.constant 0 : i32
    return %c0_i32, %c0_i32_0 : i32, i32
  }
  func.func @transform_4(%arg0: i32) -> (i32, i32) {
    %c0_i32 = arith.constant 0 : i32
    %c0_i32_0 = arith.constant 0 : i32
    return %c0_i32, %arg0 : i32, i32
  }
}

module attributes {stable_mosaic.version = 11 : i64} {
  func.func @decoder_mlp_kernel(%arg0: i32, %arg1: memref<32x128xf32, #tpu.memory_space<vmem>>, %arg2: memref<32x128xf32, #tpu.memory_space<vmem>>, %arg3: memref<56x32xf32, #tpu.memory_space<vmem>>, %arg4: memref<40x1xf32, #tpu.memory_space<vmem>>, %arg5: memref<8x128xf32, #tpu.memory_space<vmem>>) attributes {dimension_semantics = [#tpu.dimension_semantics<parallel>], iteration_bounds = array<i64: 1>, scalar_prefetch = 0 : i64, scratch_operands = 0 : i64, tpu.core_type = #tpu.core_type<tc>, window_params = [{transform_indices = @transform_0, window_bounds = array<i64: 32, 128>}, {transform_indices = @transform_1, window_bounds = array<i64: 32, 128>}, {pipeline_mode = #tpu.pipeline_mode<synchronous>, transform_indices = @transform_2, window_bounds = array<i64: 56, 32>}, {pipeline_mode = #tpu.pipeline_mode<synchronous>, transform_indices = @transform_3, window_bounds = array<i64: 40, 1>}, {transform_indices = @transform_4, window_bounds = array<i64: 8, 128>}]} {
    %c0 = arith.constant 0 : index
    %c0_0 = arith.constant 0 : index
    %0 = vector.load %arg3[%c0, %c0_0] : memref<56x32xf32, #tpu.memory_space<vmem>>, vector<16x32xf32>
    %c16 = arith.constant 16 : index
    %c0_1 = arith.constant 0 : index
    %1 = vector.load %arg3[%c16, %c0_1] : memref<56x32xf32, #tpu.memory_space<vmem>>, vector<16x32xf32>
    %c32 = arith.constant 32 : index
    %c0_2 = arith.constant 0 : index
    %2 = vector.load %arg3[%c32, %c0_2] : memref<56x32xf32, #tpu.memory_space<vmem>>, vector<16x16xf32>
    %c48 = arith.constant 48 : index
    %c0_3 = arith.constant 0 : index
    %3 = vector.load %arg3[%c48, %c0_3] : memref<56x32xf32, #tpu.memory_space<vmem>>, vector<8x16xf32>
    %c0_4 = arith.constant 0 : index
    %c0_5 = arith.constant 0 : index
    %4 = vector.load %arg4[%c0_4, %c0_5] : memref<40x1xf32, #tpu.memory_space<vmem>>, vector<16x1xf32>
    %c16_6 = arith.constant 16 : index
    %c0_7 = arith.constant 0 : index
    %5 = vector.load %arg4[%c16_6, %c0_7] : memref<40x1xf32, #tpu.memory_space<vmem>>, vector<16x1xf32>
    %c32_8 = arith.constant 32 : index
    %c0_9 = arith.constant 0 : index
    %6 = vector.load %arg4[%c32_8, %c0_9] : memref<40x1xf32, #tpu.memory_space<vmem>>, vector<8x1xf32>
    %c0_10 = arith.constant 0 : index
    %c0_11 = arith.constant 0 : index
    %7 = vector.load %arg1[%c0_10, %c0_11] : memref<32x128xf32, #tpu.memory_space<vmem>>, vector<32x128xf32>
    %c0_12 = arith.constant 0 : index
    %c0_13 = arith.constant 0 : index
    %8 = vector.load %arg2[%c0_12, %c0_13] : memref<32x128xf32, #tpu.memory_space<vmem>>, vector<32x128xf32>
    %cst = arith.constant dense<0.000000e+00> : vector<16x128xf32>
    %9 = tpu.matmul %0, %7, %cst {dimension_numbers = #tpu.dot_dimension_numbers<[1], [0], [0], [1], [0, 0, 1, 1], [], []>} : vector<16x32xf32>, vector<32x128xf32>, vector<16x128xf32> -> vector<16x128xf32>
    %cst_14 = arith.constant dense<0.000000e+00> : vector<16x128xf32>
    %10 = tpu.matmul %1, %8, %cst_14 {dimension_numbers = #tpu.dot_dimension_numbers<[1], [0], [0], [1], [0, 0, 1, 1], [], []>} : vector<16x32xf32>, vector<32x128xf32>, vector<16x128xf32> -> vector<16x128xf32>
    %11 = arith.addf %9, %10 : vector<16x128xf32>
    %12 = vector.broadcast %4 : vector<16x1xf32> to vector<16x128xf32>
    %13 = arith.addf %11, %12 : vector<16x128xf32>
    %14 = math.tanh %13 : vector<16x128xf32>
    %cst_15 = arith.constant dense<0.000000e+00> : vector<16x128xf32>
    %15 = tpu.matmul %2, %14, %cst_15 {dimension_numbers = #tpu.dot_dimension_numbers<[1], [0], [0], [1], [0, 0, 1, 1], [], []>} : vector<16x16xf32>, vector<16x128xf32>, vector<16x128xf32> -> vector<16x128xf32>
    %16 = vector.broadcast %5 : vector<16x1xf32> to vector<16x128xf32>
    %17 = arith.addf %15, %16 : vector<16x128xf32>
    %18 = math.tanh %17 : vector<16x128xf32>
    %cst_16 = arith.constant dense<0.000000e+00> : vector<8x128xf32>
    %19 = tpu.matmul %3, %18, %cst_16 {dimension_numbers = #tpu.dot_dimension_numbers<[1], [0], [0], [1], [0, 0, 1, 1], [], []>} : vector<8x16xf32>, vector<16x128xf32>, vector<8x128xf32> -> vector<8x128xf32>
    %20 = vector.broadcast %6 : vector<8x1xf32> to vector<8x128xf32>
    %21 = arith.addf %19, %20 : vector<8x128xf32>
    %c0_17 = arith.constant 0 : index
    %c0_18 = arith.constant 0 : index
    %22 = vector.load %arg5[%c0_17, %c0_18] : memref<8x128xf32, #tpu.memory_space<vmem>>, vector<8x128xf32>
    tpu.vector_store %arg5[%c0_17, %c0_18], %21 {strides = array<i32>} : memref<8x128xf32, #tpu.memory_space<vmem>>, vector<8x128xf32>,
    return
  }
  func.func @transform_0(%arg0: i32) -> (i32, i32) {
    %c0_i32 = arith.constant 0 : i32
    %c0_i32_0 = arith.constant 0 : i32
    return %c0_i32, %arg0 : i32, i32
  }
  func.func @transform_1(%arg0: i32) -> (i32, i32) {
    %c0_i32 = arith.constant 0 : i32
    %c0_i32_0 = arith.constant 0 : i32
    return %c0_i32, %arg0 : i32, i32
  }
  func.func @transform_2(%arg0: i32) -> (i32, i32) {
    %c0_i32 = arith.constant 0 : i32
    %c0_i32_0 = arith.constant 0 : i32
    %c0_i32_1 = arith.constant 0 : i32
    return %c0_i32, %c0_i32_0 : i32, i32
  }
  func.func @transform_3(%arg0: i32) -> (i32, i32) {
    %c0_i32 = arith.constant 0 : i32
    %c0_i32_0 = arith.constant 0 : i32
    %c0_i32_1 = arith.constant 0 : i32
    return %c0_i32, %c0_i32_0 : i32, i32
  }
  func.func @transform_4(%arg0: i32) -> (i32, i32) {
    %c0_i32 = arith.constant 0 : i32
    %c0_i32_0 = arith.constant 0 : i32
    return %c0_i32, %arg0 : i32, i32
  }
}

</mosaic_0001>

<bundles_post_ra>
// kernel: tpu_custom_call.1
= control target key start
LH: loop header
LB: loop body
LE: loop exit
PB: predicated region body
PF: predicated region fallthrough
CT: control target
= control target key end

     0   :  { %vm38_vm0 = vcmask 261120   ;;  %v528_v6 = vmov 0   ;;  %s637_s0 = inlined_call_operand.vmem [shape: f32[32,128], index: 0, kind: input, shape index: {}]   ;;  %s638_s1 = inlined_call_operand.vmem [shape: f32[32,128], index: 1, kind: input, shape index: {}]   ;;  %s639_s2 = inlined_call_operand.vmem [shape: f32[56,32], index: 2, kind: input, shape index: {}]   ;;  %s640_s3 = inlined_call_operand.vmem [shape: f32[40,1], index: 3, kind: input, shape index: {}]   ;;  %s641_s4 = inlined_call_operand.hbm [shape: f32[8,128], index: 4, kind: output, shape index: {}]  }
   0x1   :  { %v34_v0 = vld [vmem:[%s638_s1] sm:$0xff]  ;;  %v35_v1 = vld [vmem:[%s638_s1 + $0x8] sm:$0xff]  ;;  %v36_v2 = vld [vmem:[%s638_s1 + $0x10] sm:$0xff]  ;;  %494 = vset.pattern.permute.xlu0 %v528_v6  ;;  %495 = vset.pattern.permute.xlu1 %v528_v6 }
   0x2   :  { %v464_v3 = vpack.c.bf16 %v35_v1, %v34_v0  ;;  %v37_v4 = vld [vmem:[%s638_s1 + $0x18] sm:$0xff]  ;;  %v20_v5 = vld [vmem:[%s639_s2 + $0x10] sm:$0xff]  ;;  %v30_v8 = vld [vmem:[%s637_s0] sm:$0xff] }
   0x3   :  { %v468_v7 = vpack.c.bf16 %v37_v4, %v36_v2  ;;  %436 = vmatprep.mubr.msk.f32.mxu0 %vm38_vm0, %v20_v5  ;;  %v31_v9 = vld [vmem:[%s637_s0 + $0x8] sm:$0xff]  ;;  %v25_v10 = vld [vmem:[%s640_s3] sm:$0xff] }
   0x4   :  { %465 = vmatprep.subr.bf16.mxu0 %v464_v3  ;;  %v472_v11 = vpack.c.bf16 %v31_v9, %v30_v8  ;;  %203 = vperm.xlu0 %494, %v25_v10  }
   0x5   :  { %467 = vmatpush3.bf16.msra.mxu0 %v464_v3 }
   0x6   :  { %469 = vmatprep.subr.bf16.mxu0 %v468_v7 }
   0x7   :  { %9 = vsyncpa [#allocation3], 0  ;;  %v32_v12 = vld [vmem:[%s637_s0 + $0x10] sm:$0xff]  ;;  %v33_v13 = vld [vmem:[%s637_s0 + $0x18] sm:$0xff]  ;;  %vm225_vm1 = vcmask 130048   ;;  %v529_v33 = vmov 0.0|0.0  }
   0x8   :  { %v26_v14 = vld [vmem:[%s640_s3 + $0x8] sm:$0xff]  ;;  %v21_v15 = vld [vmem:[%s639_s2 + $0x18] sm:$0xff]  ;;  %v476_v16 = vpack.c.bf16 %v33_v13, %v32_v12  ;;  %v18_v17 = vld [vmem:[%s639_s2] sm:$0xff]  ;;  %vm530_vm2 = vmmov 0   ;;  %v531_v34 = vmov 0.0   ;;  %s532_s26 = smov [#allocation2]  }
   0x9   :  { %471 = vmatpush3.bf16.msra.mxu0 %v468_v7  ;;  %208 = vperm.xlu0 %494, %v26_v14   ;;  %v29_v18 = vld [vmem:[%s640_s3 + $0x20] sm:$0xff]  ;;  %v19_v19 = vld [vmem:[%s639_s2 + $0x8] sm:$0xff]  ;;  %v27_v21 = vld [vmem:[%s640_s3 + $0x10] sm:$0xff]  ;;  %s394_s27 = sshll.u32 %s532_s26, 4  ;;  %s395_s27 = int_to_ptr.vmem [resolvable:$true] %s394_s27 }
   0xa   :  { %473 = vmatprep.subr.bf16.mxu0 %v472_v11  ;;  %v22_v20 = vld [vmem:[%s639_s2 + $0x20] sm:$0xff]  ;;  %217 = vperm.xlu1 %495, %v27_v21   ;;  %v28_v22 = vld [vmem:[%s640_s3 + $0x18] sm:$0xff]  ;;  %v23_v32 = vld [vmem:[%s639_s2 + $0x28] sm:$0xff]  ;;  %s504_s28 = scalar_lea.vmem %s395_s27, 128  ;;  %p509_p1 = scmp.lt.s32.totalorder %s395_s27, %s395_s27 }
   0xb   :  { %454 = vmatprep.mubr.msk.f32.mxu1 %vm225_vm1, %v22_v20  ;;  %v24_v44 = vld [vmem:[%s639_s2 + $0x30] sm:$0xff]  ;;  %p505_p0 = scmp.ne.s32.totalorder %s395_s27, %s504_s28  ;;  %p510_p2 = scmp.lt.s32.totalorder %s504_s28, %s504_s28 }
   0xc   :  { %437 = vmatmul.mubr.msk.f32.vlgmr.msra.gmra.mrb[0].mxu0 %vm38_vm0, %v21_v15 }
   0xd   :  { %475 = vmatpush3.bf16.msra.mxu0 %v472_v11  ;;  %447 = vmatprep.mubr.msk.f32.mxu0 %vm38_vm0, %v18_v17  ;;  %p511_p3 = por %p510_p2, %p509_p1 }
   0xe   :  { %477 = vmatprep.subr.bf16.mxu0 %v476_v16  ;;  %311 = vperm.xlu0 %494, %v29_v18  }
   0xf   :  { %222 = vperm.xlu1 %495, %v28_v22   ;;  %p512_p4 = pnand %p511_p3, %p505_p0 }
  0x11   :  { %479 = vmatpush3.bf16.msra.mxu0 %v476_v16 }
  0x14   :  { %448 = vmatmul.mubr.msk.f32.vlgmr.msra.gmra.mrb[0].mxu0 %vm38_vm0, %v19_v19 }
  0x83   :  { %v204_v23 = vpop.permute.xlu0 %203 }
  0x88   :  { %v209_v24 = vpop.permute.xlu0 %208 }
  0x89   :  { %v218_v35 = vpop.permute.xlu1 %217 }
  0x8d   :  { %v312_v45 = vpop.permute.xlu0 %311 }
  0x8e   :  { %v223_v36 = vpop.permute.xlu1 %222 }
  0xe7   :  { %v449_v25 = vpop.f32.mrb[0].mxu0 }
  0xe8   :  { %v212_v26 = vadd.f32 %v449_v25, %v209_v24  ;;  %v192_v27 = vpop.f32.mrb[1].mxu0 }
  0xe9   :  { %v211_v28 = vadd.f32 %v204_v23, %v192_v27 }
  0xea   :  { %496 = vtanh.f32 %v212_v26 }
  0xeb   :  { %498 = vtanh.f32 %v211_v28 }
  0xf4   :  { %v497_v29 = vpop.eup %496 }
  0xf5   :  { %v499_v30 = vpop.eup %498 }
  0xf6   :  { %v480_v31 = vpack.c.bf16 %v497_v29, %v499_v30 }
  0xf8   :  { %481 = vmatprep.subr.bf16.mxu1 %v480_v31 }
  0xf9   :  { %483 = vmatpush3.bf16.msra.mxu1 %v480_v31 }
  0xfa   :  { %484 = vmatprep.subr.bf16.mxu1 %v529_v33 }
  0xfc   :  { %455 = vmatmul.mubr.msk.f32.vlgmr.msra.gmra.mrb[0].mxu1 %vm225_vm1, %v23_v32 }
  0xfd   :  { %461 = vmatprep.mubr.msk.f32.mxu1 %vm530_vm2, %v531_v34 }
 0x1cf   :  { %v456_v37 = vpop.f32.mrb[0].mxu1 }
 0x1d0   :  { %v304_v38 = vadd.f32 %v456_v37, %v223_v36  ;;  %v298_v39 = vpop.f32.mrb[1].mxu1 }
 0x1d1   :  { %v299_v40 = vadd.f32 %v298_v39, %v218_v35 }
 0x1d2   :  { %500 = vtanh.f32 %v304_v38 }
 0x1d3   :  { %502 = vtanh.f32 %v299_v40 }
 0x1dc   :  { %v501_v41 = vpop.eup %500 }
 0x1dd   :  { %v503_v42 = vpop.eup %502 }
 0x1de   :  { %v485_v43 = vpack.c.bf16 %v501_v41, %v503_v42 }
 0x1e0   :  { %486 = vmatpush3.bf16.msra.mxu1 %v485_v43 }
 0x1e3   :  { %462 = vmatmul.mubr.msk.f32.vlgmr.msra.gmra.mrb[2].mxu1 %vm225_vm1, %v24_v44 }
 0x2b6   :  { %v383_v46 = vpop.f32.mrb[2].mxu1 }
 0x2b7   :  { %v384_v47 = vadd.f32 %v383_v46, %v312_v45  ;;  %v463_v48 = vpop.f32.mrb[3].mxu1 }
 0x2b9   :  { %387 = vst [vmem:[#allocation2] sm:$0xff] %v384_v47 }
 0x2ba   :  { %515 = shalt.err (!%p512_p4)
}
 0x2bb   :  { %s516_s2 = scalar_lea.hbm %s641_s4, 128 }
 0x2bc   :  { %p517_p5 = scmp.ne.s32.totalorder %s641_s4, %s516_s2  ;;  %p520_p6 = scmp.lt.u32.totalorder %s516_s2, %s641_s4 }
 0x2be   :  { %p522_p7 = pnand %p520_p6, %p517_p5 }
 0x2c0   :  { %525 = shalt.err (!%p522_p7)
}
 0x2c1   :  { %397 = dma.vmem_to_hbm [thread:$0]  %s395_s27, 128, %s641_s4, [#allocation3]  }
 0x2c2   :  { %526 = dma.done.wait [#allocation3], 128  }
 0x2c3   :  { %527 = vsyncadd [#allocation3], 4294967168 }
 0x2c4   :  { %401 = vsyncpa [#allocation3], 1 }

// kernel: tpu_custom_call.1
= control target key start
LH: loop header
LB: loop body
LE: loop exit
PB: predicated region body
PF: predicated region fallthrough
CT: control target
= control target key end

     0   :  { %vm38_vm0 = vcmask 261120   ;;  %v528_v6 = vmov 0   ;;  %s637_s0 = inlined_call_operand.vmem [shape: f32[32,128], index: 0, kind: input, shape index: {}]   ;;  %s638_s1 = inlined_call_operand.vmem [shape: f32[32,128], index: 1, kind: input, shape index: {}]   ;;  %s639_s2 = inlined_call_operand.vmem [shape: f32[56,32], index: 2, kind: input, shape index: {}]   ;;  %s640_s3 = inlined_call_operand.vmem [shape: f32[40,1], index: 3, kind: input, shape index: {}]   ;;  %s641_s4 = inlined_call_operand.hbm [shape: f32[8,128], index: 4, kind: output, shape index: {}]  }
   0x1   :  { %v34_v0 = vld [vmem:[%s638_s1] sm:$0xff]  ;;  %v35_v1 = vld [vmem:[%s638_s1 + $0x8] sm:$0xff]  ;;  %v36_v2 = vld [vmem:[%s638_s1 + $0x10] sm:$0xff]  ;;  %494 = vset.pattern.permute.xlu0 %v528_v6  ;;  %495 = vset.pattern.permute.xlu1 %v528_v6 }
   0x2   :  { %v464_v3 = vpack.c.bf16 %v35_v1, %v34_v0  ;;  %v37_v4 = vld [vmem:[%s638_s1 + $0x18] sm:$0xff]  ;;  %v20_v5 = vld [vmem:[%s639_s2 + $0x10] sm:$0xff]  ;;  %v30_v8 = vld [vmem:[%s637_s0] sm:$0xff] }
   0x3   :  { %v468_v7 = vpack.c.bf16 %v37_v4, %v36_v2  ;;  %436 = vmatprep.mubr.msk.f32.mxu0 %vm38_vm0, %v20_v5  ;;  %v31_v9 = vld [vmem:[%s637_s0 + $0x8] sm:$0xff]  ;;  %v25_v10 = vld [vmem:[%s640_s3] sm:$0xff] }
   0x4   :  { %465 = vmatprep.subr.bf16.mxu0 %v464_v3  ;;  %v472_v11 = vpack.c.bf16 %v31_v9, %v30_v8  ;;  %203 = vperm.xlu0 %494, %v25_v10  }
   0x5   :  { %467 = vmatpush3.bf16.msra.mxu0 %v464_v3 }
   0x6   :  { %469 = vmatprep.subr.bf16.mxu0 %v468_v7 }
   0x7   :  { %9 = vsyncpa [#allocation3], 0  ;;  %v32_v12 = vld [vmem:[%s637_s0 + $0x10] sm:$0xff]  ;;  %v33_v13 = vld [vmem:[%s637_s0 + $0x18] sm:$0xff]  ;;  %vm225_vm1 = vcmask 130048   ;;  %v529_v33 = vmov 0.0|0.0  }
   0x8   :  { %v26_v14 = vld [vmem:[%s640_s3 + $0x8] sm:$0xff]  ;;  %v21_v15 = vld [vmem:[%s639_s2 + $0x18] sm:$0xff]  ;;  %v476_v16 = vpack.c.bf16 %v33_v13, %v32_v12  ;;  %v18_v17 = vld [vmem:[%s639_s2] sm:$0xff]  ;;  %vm530_vm2 = vmmov 0   ;;  %v531_v34 = vmov 0.0   ;;  %s532_s26 = smov [#allocation2]  }
   0x9   :  { %471 = vmatpush3.bf16.msra.mxu0 %v468_v7  ;;  %208 = vperm.xlu0 %494, %v26_v14   ;;  %v29_v18 = vld [vmem:[%s640_s3 + $0x20] sm:$0xff]  ;;  %v19_v19 = vld [vmem:[%s639_s2 + $0x8] sm:$0xff]  ;;  %v27_v21 = vld [vmem:[%s640_s3 + $0x10] sm:$0xff]  ;;  %s394_s27 = sshll.u32 %s532_s26, 4  ;;  %s395_s27 = int_to_ptr.vmem [resolvable:$true] %s394_s27 }
   0xa   :  { %473 = vmatprep.subr.bf16.mxu0 %v472_v11  ;;  %v22_v20 = vld [vmem:[%s639_s2 + $0x20] sm:$0xff]  ;;  %217 = vperm.xlu1 %495, %v27_v21   ;;  %v28_v22 = vld [vmem:[%s640_s3 + $0x18] sm:$0xff]  ;;  %v23_v32 = vld [vmem:[%s639_s2 + $0x28] sm:$0xff]  ;;  %s504_s28 = scalar_lea.vmem %s395_s27, 128  ;;  %p509_p1 = scmp.lt.s32.totalorder %s395_s27, %s395_s27 }
   0xb   :  { %454 = vmatprep.mubr.msk.f32.mxu1 %vm225_vm1, %v22_v20  ;;  %v24_v44 = vld [vmem:[%s639_s2 + $0x30] sm:$0xff]  ;;  %p505_p0 = scmp.ne.s32.totalorder %s395_s27, %s504_s28  ;;  %p510_p2 = scmp.lt.s32.totalorder %s504_s28, %s504_s28 }
   0xc   :  { %437 = vmatmul.mubr.msk.f32.vlgmr.msra.gmra.mrb[0].mxu0 %vm38_vm0, %v21_v15 }
   0xd   :  { %475 = vmatpush3.bf16.msra.mxu0 %v472_v11  ;;  %447 = vmatprep.mubr.msk.f32.mxu0 %vm38_vm0, %v18_v17  ;;  %p511_p3 = por %p510_p2, %p509_p1 }
   0xe   :  { %477 = vmatprep.subr.bf16.mxu0 %v476_v16  ;;  %311 = vperm.xlu0 %494, %v29_v18  }
   0xf   :  { %222 = vperm.xlu1 %495, %v28_v22   ;;  %p512_p4 = pnand %p511_p3, %p505_p0 }
  0x11   :  { %479 = vmatpush3.bf16.msra.mxu0 %v476_v16 }
  0x14   :  { %448 = vmatmul.mubr.msk.f32.vlgmr.msra.gmra.mrb[0].mxu0 %vm38_vm0, %v19_v19 }
  0x83   :  { %v204_v23 = vpop.permute.xlu0 %203 }
  0x88   :  { %v209_v24 = vpop.permute.xlu0 %208 }
  0x89   :  { %v218_v35 = vpop.permute.xlu1 %217 }
  0x8d   :  { %v312_v45 = vpop.permute.xlu0 %311 }
  0x8e   :  { %v223_v36 = vpop.permute.xlu1 %222 }
  0xe7   :  { %v449_v25 = vpop.f32.mrb[0].mxu0 }
  0xe8   :  { %v212_v26 = vadd.f32 %v449_v25, %v209_v24  ;;  %v192_v27 = vpop.f32.mrb[1].mxu0 }
  0xe9   :  { %v211_v28 = vadd.f32 %v204_v23, %v192_v27 }
  0xea   :  { %496 = vtanh.f32 %v212_v26 }
  0xeb   :  { %498 = vtanh.f32 %v211_v28 }
  0xf4   :  { %v497_v29 = vpop.eup %496 }
  0xf5   :  { %v499_v30 = vpop.eup %498 }
  0xf6   :  { %v480_v31 = vpack.c.bf16 %v497_v29, %v499_v30 }
  0xf8   :  { %481 = vmatprep.subr.bf16.mxu1 %v480_v31 }
  0xf9   :  { %483 = vmatpush3.bf16.msra.mxu1 %v480_v31 }
  0xfa   :  { %484 = vmatprep.subr.bf16.mxu1 %v529_v33 }
  0xfc   :  { %455 = vmatmul.mubr.msk.f32.vlgmr.msra.gmra.mrb[0].mxu1 %vm225_vm1, %v23_v32 }
  0xfd   :  { %461 = vmatprep.mubr.msk.f32.mxu1 %vm530_vm2, %v531_v34 }
 0x1cf   :  { %v456_v37 = vpop.f32.mrb[0].mxu1 }
 0x1d0   :  { %v304_v38 = vadd.f32 %v456_v37, %v223_v36  ;;  %v298_v39 = vpop.f32.mrb[1].mxu1 }
 0x1d1   :  { %v299_v40 = vadd.f32 %v298_v39, %v218_v35 }
 0x1d2   :  { %500 = vtanh.f32 %v304_v38 }
 0x1d3   :  { %502 = vtanh.f32 %v299_v40 }
 0x1dc   :  { %v501_v41 = vpop.eup %500 }
 0x1dd   :  { %v503_v42 = vpop.eup %502 }
 0x1de   :  { %v485_v43 = vpack.c.bf16 %v501_v41, %v503_v42 }
 0x1e0   :  { %486 = vmatpush3.bf16.msra.mxu1 %v485_v43 }
 0x1e3   :  { %462 = vmatmul.mubr.msk.f32.vlgmr.msra.gmra.mrb[2].mxu1 %vm225_vm1, %v24_v44 }
 0x2b6   :  { %v383_v46 = vpop.f32.mrb[2].mxu1 }
 0x2b7   :  { %v384_v47 = vadd.f32 %v383_v46, %v312_v45  ;;  %v463_v48 = vpop.f32.mrb[3].mxu1 }
 0x2b9   :  { %387 = vst [vmem:[#allocation2] sm:$0xff] %v384_v47 }
 0x2ba   :  { %515 = shalt.err (!%p512_p4)
}
 0x2bb   :  { %s516_s2 = scalar_lea.hbm %s641_s4, 128 }
 0x2bc   :  { %p517_p5 = scmp.ne.s32.totalorder %s641_s4, %s516_s2  ;;  %p520_p6 = scmp.lt.u32.totalorder %s516_s2, %s641_s4 }
 0x2be   :  { %p522_p7 = pnand %p520_p6, %p517_p5 }
 0x2c0   :  { %525 = shalt.err (!%p522_p7)
}
 0x2c1   :  { %397 = dma.vmem_to_hbm [thread:$0]  %s395_s27, 128, %s641_s4, [#allocation3]  }
 0x2c2   :  { %526 = dma.done.wait [#allocation3], 128  }
 0x2c3   :  { %527 = vsyncadd [#allocation3], 4294967168 }
 0x2c4   :  { %401 = vsyncpa [#allocation3], 1 }

</bundles_post_ra>
